<compile_context>
chip_gen: v7x
topology: tpu7x:2x2x1
jax: 0.10.0
libtpu: 0.0.40
codegen_flags: <defaults>
</compile_context>

<pallas_src>
import functools

import jax
import jax.numpy as jnp
from jax.experimental import pallas as pl
from jax.experimental.pallas import tpu as pltpu

_PAIRWISE_EPS = 1e-6   # torch F.pairwise_distance default eps
_COSINE_EPS = 1e-8     # torch F.cosine_similarity default eps


def _triplet_loss_kernel(a_ref, p_ref, n_ref, o_ref, *, margin, metric):
    """Per-row hinge loss for one (TB, D) batch tile, stored lane-dense (1, TB)."""
    a = a_ref[...].astype(jnp.float32)
    p = p_ref[...].astype(jnp.float32)
    n = n_ref[...].astype(jnp.float32)

    if metric == "euclidean":
        dp = a - p + _PAIRWISE_EPS
        dn = a - n + _PAIRWISE_EPS
        pos = jnp.sqrt(jnp.sum(dp * dp, axis=-1))
        neg = jnp.sqrt(jnp.sum(dn * dn, axis=-1))
    elif metric == "manhattan":
        pos = jnp.sum(jnp.abs(a - p + _PAIRWISE_EPS), axis=-1)
        neg = jnp.sum(jnp.abs(a - n + _PAIRWISE_EPS), axis=-1)
    elif metric == "cosine":
        a_nrm = jnp.maximum(jnp.sqrt(jnp.sum(a * a, axis=-1)), _COSINE_EPS)
        p_nrm = jnp.maximum(jnp.sqrt(jnp.sum(p * p, axis=-1)), _COSINE_EPS)
        n_nrm = jnp.maximum(jnp.sqrt(jnp.sum(n * n, axis=-1)), _COSINE_EPS)
        pos = 1.0 - jnp.sum(a * p, axis=-1) / (a_nrm * p_nrm)
        neg = 1.0 - jnp.sum(a * n, axis=-1) / (a_nrm * n_nrm)
    else:
        raise ValueError(f"Unknown distance metric for TripletLoss: {metric}")

    hinge = jnp.maximum(pos - neg + margin, 0.0)            # (TB,)
    o_ref[...] = hinge.reshape(1, -1).astype(o_ref.dtype)   # lane-dense (1, TB)


def _physical_vmem_bytes():
    """Per-core physical VMEM (generation-aware); conservative fallback 64 MiB."""
    try:
        info = pltpu.get_tpu_info()
        vmem = int(getattr(info, "vmem_capacity_bytes", 0))
        if vmem > 0:
            return vmem
    except Exception:
        pass
    return 64 * 1024 * 1024   # v7x per-TC value; safe lower bound everywhere


def _pick_block_rows(batch, dim, itemsize, ws_budget_bytes):
    """Largest row tile whose full working set fits the VMEM working-set budget.

    Per-row bytes counted:
      * 3 input streams x 2 pipeline buffers, in the input dtype (DMA buffers)
      * ~5 f32 row-temporaries inside the kernel (a/p/n casts + dp/dn diffs)
      * lane-dense f32 output x 2 buffers (negligible, but counted)
    """
    bytes_per_row = 3 * 2 * dim * itemsize + 5 * dim * 4 + 2 * 4
    rows = max(1, ws_budget_bytes // max(1, bytes_per_row))
    if rows >= batch:
        return batch                      # single tile == full array; no alignment needed
    # Tiled path: lane-dense (1, TB) output block requires TB % 128 == 0
    # (which also satisfies the %8 sublane rule for the (TB, D) input blocks).
    rows = max(128, (rows // 128) * 128)
    return min(rows, batch)


def triplet_loss(anchor, positive, negative, *, margin=0.3,
                 distance_metric="euclidean", block_rows=None):
    """Pallas TripletLoss forward. anchor/positive/negative: (B, D)."""
    if distance_metric not in ("euclidean", "manhattan", "cosine"):
        raise ValueError(
            f"Unknown distance metric for TripletLoss: {distance_metric}")
    B, D = anchor.shape
    itemsize = jnp.dtype(anchor.dtype).itemsize

    vmem_phys = _physical_vmem_bytes()
    ws_budget = (vmem_phys * 5) // 8              # ~40 MiB v7x, ~80 MiB v5e/v6e
    vmem_limit = max(32 * 1024 * 1024, (vmem_phys * 3) // 4)

    if block_rows is None:
        tb = _pick_block_rows(B, D, itemsize, ws_budget)
    else:
        tb = int(block_rows)
        if tb >= B:
            tb = B
        else:
            tb = min(B, max(128, (tb // 128) * 128))   # lane-dense output tiling rule
    num_tiles = pl.cdiv(B, tb)

    kernel = functools.partial(
        _triplet_loss_kernel, margin=float(margin), metric=distance_metric)

    in_spec = pl.BlockSpec((tb, D), lambda i: (i, 0))
    per_row = pl.pallas_call(
        kernel,
        out_shape=jax.ShapeDtypeStruct((1, B), jnp.float32),
        grid=(num_tiles,),
        in_specs=[in_spec, in_spec, in_spec],
        out_specs=pl.BlockSpec((1, tb), lambda i: (0, i)),
        compiler_params=pltpu.CompilerParams(
            dimension_semantics=("parallel",),
            vmem_limit_bytes=int(vmem_limit)),
    )(anchor, positive, negative)

    # Tiny final reduction (B floats) in the wrapper: exact mean over the true
    # batch, independent of tile padding, and parallel-safe across cores.
    return jnp.sum(per_row) / B


def _reference_triplet_loss(anchor, positive, negative, margin=0.3,
                            distance_metric="euclidean"):
    """Pure-JAX reference mirroring the PyTorch module."""
    anchor = anchor.astype(jnp.float32)
    positive = positive.astype(jnp.float32)
    negative = negative.astype(jnp.float32)

    def pairwise(x1, x2, p):
        d = x1 - x2 + _PAIRWISE_EPS
        if p == 2:
            return jnp.sqrt(jnp.sum(d * d, axis=-1))
        return jnp.sum(jnp.abs(d), axis=-1)

    def cosine(x1, x2):
        n1 = jnp.maximum(jnp.linalg.norm(x1, axis=-1), _COSINE_EPS)
        n2 = jnp.maximum(jnp.linalg.norm(x2, axis=-1), _COSINE_EPS)
        return 1.0 - jnp.sum(x1 * x2, axis=-1) / (n1 * n2)

    if distance_metric == "euclidean":
        pos, neg = pairwise(anchor, positive, 2), pairwise(anchor, negative, 2)
    elif distance_metric == "manhattan":
        pos, neg = pairwise(anchor, positive, 1), pairwise(anchor, negative, 1)
    else:
        pos, neg = cosine(anchor, positive), cosine(anchor, negative)
    return jnp.mean(jnp.maximum(pos - neg + margin, 0.0))


if __name__ == "__main__":
    key = jax.random.PRNGKey(0)
    ok = True

    def run_case(B, D, dtype, metrics, block_rows=None, tol=1e-5):
        global ok
        ka, kp, kn = jax.random.split(jax.random.fold_in(key, B * 1000 + D), 3)
        a = jax.random.normal(ka, (B, D), dtype=jnp.float32).astype(dtype)
        p = jax.random.normal(kp, (B, D), dtype=jnp.float32).astype(dtype)
        n = jax.random.normal(kn, (B, D), dtype=jnp.float32).astype(dtype)
        for metric in metrics:
            got = jax.block_until_ready(
                triplet_loss(a, p, n, margin=0.3, distance_metric=metric,
                             block_rows=block_rows))
            want = _reference_triplet_loss(a, p, n, margin=0.3,
                                           distance_metric=metric)
            if not jnp.allclose(got, want, atol=tol, rtol=tol):
                ok = False
                print(f"MISMATCH B={B} D={D} dtype={dtype} metric={metric}: "
                      f"got={got}, want={want}")

    # Small shape consistent with the module (single-tile, full-array blocks).
    run_case(2, 32, jnp.float32, ("euclidean", "manhattan", "cosine"))
    # Multi-tile path with a ragged last tile (grid=3: rows 128/128/44,
    # lane-dense output blocks 128/128/44).
    run_case(300, 128, jnp.float32, ("euclidean", "cosine"), block_rows=128)
    # bf16 inputs: DMA'd as bf16, cast to f32 inside the kernel.
    run_case(16, 128, jnp.bfloat16, ("euclidean",), tol=1e-2)

    if ok:
        print("KERNEL_OK")
</pallas_src>

<mosaic_0001>
module attributes {stable_mosaic.version = 11 : i64} {
  func.func @_triplet_loss_kernel(%arg0: i32, %arg1: memref<2x32xf32, #tpu.memory_space<vmem>>, %arg2: memref<2x32xf32, #tpu.memory_space<vmem>>, %arg3: memref<2x32xf32, #tpu.memory_space<vmem>>, %arg4: memref<1x2xf32, #tpu.memory_space<vmem>>) attributes {dimension_semantics = [#tpu.dimension_semantics<parallel>], iteration_bounds = array<i64: 1>, scalar_prefetch = 0 : i64, scratch_operands = 0 : i64, tpu.core_type = #tpu.core_type<tc>, window_params = [{transform_indices = @transform_0, window_bounds = array<i64: 2, 32>}, {transform_indices = @transform_1, window_bounds = array<i64: 2, 32>}, {transform_indices = @transform_2, window_bounds = array<i64: 2, 32>}, {transform_indices = @transform_3, window_bounds = array<i64: 1, 2>}]} {
    %c0 = arith.constant 0 : index
    %c0_0 = arith.constant 0 : index
    %0 = vector.load %arg1[%c0, %c0_0] : memref<2x32xf32, #tpu.memory_space<vmem>>, vector<2x32xf32>
    %c0_1 = arith.constant 0 : index
    %c0_2 = arith.constant 0 : index
    %1 = vector.load %arg2[%c0_1, %c0_2] : memref<2x32xf32, #tpu.memory_space<vmem>>, vector<2x32xf32>
    %c0_3 = arith.constant 0 : index
    %c0_4 = arith.constant 0 : index
    %2 = vector.load %arg3[%c0_3, %c0_4] : memref<2x32xf32, #tpu.memory_space<vmem>>, vector<2x32xf32>
    %3 = arith.subf %0, %1 : vector<2x32xf32>
    %cst = arith.constant 9.99999997E-7 : f32
    %4 = vector.broadcast %cst : f32 to vector<2x32xf32>
    %5 = arith.addf %3, %4 : vector<2x32xf32>
    %6 = arith.subf %0, %2 : vector<2x32xf32>
    %cst_5 = arith.constant 9.99999997E-7 : f32
    %7 = vector.broadcast %cst_5 : f32 to vector<2x32xf32>
    %8 = arith.addf %6, %7 : vector<2x32xf32>
    %9 = arith.mulf %5, %5 : vector<2x32xf32>
    %cst_6 = arith.constant dense<0.000000e+00> : vector<2xf32>
    %10 = vector.multi_reduction <add>, %9, %cst_6 [1] : vector<2x32xf32> to vector<2xf32>
    %11 = math.sqrt %10 : vector<2xf32>
    %12 = arith.mulf %8, %8 : vector<2x32xf32>
    %cst_7 = arith.constant dense<0.000000e+00> : vector<2xf32>
    %13 = vector.multi_reduction <add>, %12, %cst_7 [1] : vector<2x32xf32> to vector<2xf32>
    %14 = math.sqrt %13 : vector<2xf32>
    %15 = arith.subf %11, %14 : vector<2xf32>
    %cst_8 = arith.constant 3.000000e-01 : f32
    %16 = vector.broadcast %cst_8 : f32 to vector<2xf32>
    %17 = arith.addf %15, %16 : vector<2xf32>
    %cst_9 = arith.constant 0.000000e+00 : f32
    %18 = vector.broadcast %cst_9 : f32 to vector<2xf32>
    %19 = arith.maximumf %17, %18 : vector<2xf32>
    %20 = vector.shape_cast %19 : vector<2xf32> to vector<1x2xf32>
    %c0_10 = arith.constant 0 : index
    %c0_11 = arith.constant 0 : index
    %21 = vector.load %arg4[%c0_10, %c0_11] : memref<1x2xf32, #tpu.memory_space<vmem>>, vector<1x2xf32>
    tpu.vector_store %arg4[%c0_10, %c0_11], %20 {strides = array<i32>} : memref<1x2xf32, #tpu.memory_space<vmem>>, vector<1x2xf32>,
    return
  }
  func.func @transform_0(%arg0: i32) -> (i32, i32) {
    %c0_i32 = arith.constant 0 : i32
    %c0_i32_0 = arith.constant 0 : i32
    return %arg0, %c0_i32 : i32, i32
  }
  func.func @transform_1(%arg0: i32) -> (i32, i32) {
    %c0_i32 = arith.constant 0 : i32
    %c0_i32_0 = arith.constant 0 : i32
    return %arg0, %c0_i32 : i32, i32
  }
  func.func @transform_2(%arg0: i32) -> (i32, i32) {
    %c0_i32 = arith.constant 0 : i32
    %c0_i32_0 = arith.constant 0 : i32
    return %arg0, %c0_i32 : i32, i32
  }
  func.func @transform_3(%arg0: i32) -> (i32, i32) {
    %c0_i32 = arith.constant 0 : i32
    %c0_i32_0 = arith.constant 0 : i32
    return %c0_i32, %arg0 : i32, i32
  }
}

</mosaic_0001>

<bundles_post_ra>
// kernel: tpu_custom_call.1
= control target key start
LH: loop header
LB: loop body
LE: loop exit
PB: predicated region body
PF: predicated region fallthrough
CT: control target
= control target key end

     0   :  { %8 = vsyncpa [#allocation3], 0  ;;  %s191_s0 = inlined_call_operand.hbm [shape: f32[2,32], index: 0, kind: input, shape index: {}]   ;;  %s192_s1 = inlined_call_operand.vmem [shape: f32[2,32], index: 1, kind: input, shape index: {}]   ;;  %s193_s2 = inlined_call_operand.vmem [shape: f32[2,32], index: 2, kind: input, shape index: {}]   ;;  %s194_s3 = inlined_call_operand.hbm [shape: f32[1,2], index: 3, kind: output, shape index: {}]  }
   0x1   :  { %9 = vsyncpa [#allocation4], 0  ;;  %s139_s12 = smov [#allocation2]   ;;  %s91_s16 = scalar_lea.hbm %s191_s0, 32 }
   0x2   :  { %s16_s13 = sshll.u32 %s139_s12, 4  ;;  %p92_p0 = scmp.ne.s32.totalorder %s191_s0, %s91_s16  ;;  %s17_s13 = int_to_ptr.vmem [resolvable:$true] %s16_s13 }
   0x3   :  { %p95_p1 = scmp.lt.u32.totalorder %s91_s16, %s191_s0 }
   0x5   :  { %p97_p2 = pnand %p95_p1, %p92_p0 }
   0x7   :  { %100 = shalt.err (!%p97_p2)
}
   0x8   :  { %s101_s21 = scalar_lea.vmem %s17_s13, 32  ;;  %p106_p4 = scmp.lt.s32.totalorder %s17_s13, %s17_s13 }
   0x9   :  { %p102_p3 = scmp.ne.s32.totalorder %s17_s13, %s101_s21  ;;  %p107_p5 = scmp.lt.s32.totalorder %s101_s21, %s101_s21 }
   0xb   :  { %p108_p6 = por %p107_p5, %p106_p4 }
   0xd   :  { %p109_p7 = pnand %p108_p6, %p102_p3 }
   0xf   :  { %112 = shalt.err (!%p109_p7)
}
  0x10   :  { %19 = dma.hbm_to_vmem [thread:$0]  %s191_s0, 32, %s17_s13, [#allocation3]  }
  0x11   :  { %135 = dma.done.wait [#allocation3], 32  }
  0x12   :  { %136 = vsyncadd [#allocation3], 4294967264  ;;  %v27_v0 = vld [vmem:[#allocation2] sm:$0x3]  ;;  %vm35_vm0 = vcmask 254976   ;;  %v61_v15 = vlaneseq  ;;  %s140_s0 = smov [#allocation5]  }
  0x13   :  { %v28_v1 = vld [vmem:[%s192_s1] sm:$0x3]  ;;  %s76_s1 = sshll.u32 %s140_s0, 4  ;;  %vm68_vm5 = vcmask 8192   ;;  %s77_s1 = int_to_ptr.vmem [resolvable:$true] %s76_s1 }
  0x14   :  { %v29_v2 = vld [vmem:[%s193_s2] sm:$0x3]  ;;  %v30_v3 = vsub.f32 %v27_v0, %v28_v1  ;;  %v62_v21 = vand.u32 127, %v61_v15  ;;  %v64_v23 = vshrl.u32 %v61_v15, 7  ;;  %s113_s2 = scalar_lea.vmem %s77_s1, 16  ;;  %s117_s28 = scalar_lea.vmem %s77_s1, 32 }
  0x15   :  { %v32_v4 = vsub.f32 %v27_v0, %v29_v2  ;;  %p114_p8 = scmp.ne.s32.totalorder %s77_s1, %s113_s2  ;;  %p118_p9 = scmp.lt.s32.totalorder %s77_s1, %s77_s1 }
  0x16   :  { %v31_v5 = vadd.f32 1e-06, %v30_v3  ;;  %v65_v28 = vsub.s32 %v62_v21, %v64_v23  ;;  %p119_p10 = scmp.lt.s32.totalorder %s117_s28, %s113_s2 }
  0x17   :  { %v33_v6 = vadd.f32 1e-06, %v32_v4 }
  0x18   :  { %v34_v7 = vmul.f32 %v31_v5, %v31_v5  ;;  %p120_p11 = por %p119_p10, %p118_p9 }
  0x19   :  { %v46_v8 = vmul.f32 %v33_v6, %v33_v6 }
  0x1a   :  { %v36_v9 = vsel %vm35_vm0, %v34_v7, 0.0  ;;  %p121_p12 = pnand %p120_p11, %p114_p8 }
  0x1b   :  { %37 = vadd.xlane.f32.xlu0 %v36_v9  ;;  %v47_v10 = vsel %vm35_vm0, %v46_v8, 0.0 }
  0x1f   :  { %48 = vadd.xlane.f32.xlu0 %v47_v10 }
  0xa8   :  { %v38_v11 = vpop.xlane.xlu0 %37 }
  0xa9   :  { %87 = vrsqrt.f32 %v38_v11  ;;  %vm41_vm1 = vcmp.eq.f32.partialorder %v38_v11, inf  ;;  %v44_v19 = vand.u32 2147483648, %v38_v11  ;;  %vm43_vm3 = vcmp.eq.f32.partialorder %v38_v11, 0.0 }
  0xac   :  { %v49_v12 = vpop.xlane.xlu0 %48 }
  0xad   :  { %89 = vrsqrt.f32 %v49_v12  ;;  %vm52_vm2 = vcmp.eq.f32.partialorder %v49_v12, inf  ;;  %v55_v20 = vand.u32 2147483648, %v49_v12  ;;  %vm54_vm4 = vcmp.eq.f32.partialorder %v49_v12, 0.0 }
  0xb3   :  { %v88_v13 = vpop.eup %87 }
  0xb4   :  { %v40_v14 = vmul.f32 %v88_v13, %v38_v11 }
  0xb6   :  { %v42_v17 = vsel %vm41_vm1, %v38_v11, %v40_v14 }
  0xb7   :  { %v90_v16 = vpop.eup %89  ;;  %v45_v24 = vsel %vm43_vm3, %v44_v19, %v42_v17 }
  0xb8   :  { %v51_v18 = vmul.f32 %v90_v16, %v49_v12 }
  0xba   :  { %v53_v22 = vsel %vm52_vm2, %v49_v12, %v51_v18 }
  0xbb   :  { %v56_v25 = vsel %vm54_vm4, %v55_v20, %v53_v22 }
  0xbc   :  { %v57_v26 = vsub.f32 %v45_v24, %v56_v25 }
  0xbe   :  { %v58_v27 = vadd.f32 0.3, %v57_v26 }
  0xc0   :  { %v59_v29 = vmax.f32 %v58_v27, 0.0 }
  0xc2   :  { %v66_v30 = vrot.slane %v59_v29, %v65_v28 }
  0xc4   :  { %69 = vst.msk [vmem:[#allocation5] sm:$0x1] %vm68_vm5, %v66_v30 }
  0xc5   :  { %124 = shalt.err (!%p121_p12)
}
  0xc6   :  { %s125_s4 = scalar_lea.hbm %s194_s3, 16 }
  0xc7   :  { %p126_p13 = scmp.ne.s32.totalorder %s194_s3, %s125_s4  ;;  %p129_p0 = scmp.lt.u32.totalorder %s125_s4, %s194_s3 }
  0xc9   :  { %p131_p1 = pnand %p129_p0, %p126_p13 }
  0xcb   :  { %134 = shalt.err (!%p131_p1)
}
  0xcc   :  { %79 = dma.vmem_to_hbm [thread:$0]  %s77_s1, 16, %s194_s3, [#allocation4]  }
  0xcd   :  { %137 = dma.done.wait [#allocation4], 16  }
  0xce   :  { %138 = vsyncadd [#allocation4], 4294967280 }
  0xcf   :  { %83 = vsyncpa [#allocation3], 1 }
  0xd0   :  { %84 = vsyncpa [#allocation4], 1 }

</bundles_post_ra>
